<compile_context>
chip_gen: v6e
topology: v6e:2x2x1
jax: 0.10.0
libtpu: 0.0.40
codegen_flags: <defaults>
</compile_context>

<pallas_src>
import functools

import jax
import jax.numpy as jnp
from jax.experimental import pallas as pl
from jax.experimental.pallas import tpu as pltpu

_LANE = 128
_SUBLANE = 8
_VMEM_TILE_BUDGET = 12 * 1024 * 1024   # pipelined tiles + in-kernel f32 working set
_VMEM_LIMIT_BYTES = 40 * 1024 * 1024   # scoped-VMEM limit, safe on v7x (64 MiB core)
_MAX_BATCH_TILE = 1024                 # 512-1024 rows already ~85% of HBM roofline


def crossnet_kernel(x0_ref, wT_ref, gamma_ref, betaL_ref, out_ref, *, num_layers):
    """One batch tile of the collapsed CrossNet recurrence.

    x0_ref   : (TB, Dp)  input tile X_0 (feature dim lane-padded)
    wT_ref   : (Dp, Lp)  transposed, zero-padded weight matrix
    gamma_ref: (1, Lp)   per-layer scalars beta_i . w_i
    betaL_ref: (1, Dp)   final bias offset sum_j b_j
    out_ref  : (TB, Dp)  output tile X_L
    """
    # Load + cast X_0 exactly once (hoisted per perf review).
    x0 = x0_ref[...].astype(jnp.float32)                          # (TB, Dp)

    # All per-layer row dots c[:, i] = X_0 . w_i in one MXU matmul.
    c = jnp.dot(x0, wT_ref[...], preferred_element_type=jnp.float32)   # (TB, Lp)
    gamma = gamma_ref[...]                                         # (1, Lp)

    # Tiny per-row scalar recurrence (static unroll; (TB, 1) work per layer).
    alpha = jnp.ones((x0.shape[0], 1), jnp.float32)                # (TB, 1)
    for i in range(num_layers):
        alpha = alpha * (1.0 + c[:, i:i + 1]) + gamma[:, i:i + 1]

    # Single FMA pass over the tile, then cast + lane-dense store.
    out = alpha * x0 + betaL_ref[...]                              # (TB, Dp)
    out_ref[...] = out.astype(out_ref.dtype)


def _round_up(x, m):
    return ((x + m - 1) // m) * m


def _tensorcores_per_chip():
    """2 on v7x (grid split pays off), 1 on single-TC chips (v5e/v6e)."""
    try:
        kind = jax.devices()[0].device_kind.lower()
    except Exception:
        return 1
    return 2 if "v7" in kind else 1


def _pick_batch_tile(batch, dp, lp, io_itemsize):
    """Largest VMEM-friendly batch tile (multiple of 8)."""
    # Constant (batch-independent) buffers: double-buffered W^T, gamma, beta_L.
    const_bytes = 2 * (dp * lp * 4 + lp * 4 + dp * 4)
    # Per-batch-row bytes: double-buffered in/out pipelined tiles at the real
    # I/O itemsize, plus the in-kernel f32 working set (x0 cast, output temp,
    # one extra temp) and the (TB, Lp) f32 matmul result.
    per_row = 2 * 2 * dp * io_itemsize + 3 * dp * 4 + lp * 4
    budget = max(_VMEM_TILE_BUDGET - const_bytes, per_row * _SUBLANE)
    bt = max(_SUBLANE, budget // per_row)
    bt = min(bt, _MAX_BATCH_TILE)
    bt = min(bt, _round_up(batch, _SUBLANE))          # never pad batch past one tile
    bt = max(_SUBLANE, (bt // _SUBLANE) * _SUBLANE)
    # Only split a batch that fits in one tile when the chip really has two
    # TensorCores (v7x); on v5e/v6e the extra grid step is pure overhead.
    if _tensorcores_per_chip() >= 2:
        half = max(_SUBLANE, _round_up(-(-batch // 2), _SUBLANE))
        bt = min(bt, half)
    return bt


def crossnet_forward(x0, weights, biases, *, batch_tile=None):
    """x0: (B, D), weights: (L, D), biases: (L, D) -> (B, D).

    Matches CrossNet.forward: X_{i+1} = X_i + (X_i @ w_i) * X_0 + b_i.
    """
    B, D = x0.shape
    L = int(weights.shape[0])
    if L == 0:
        return x0

    f32 = jnp.float32
    w32 = weights.astype(f32)
    b32 = biases.astype(f32)

    # Host-side precompute of the row-independent part of the recurrence.
    beta_prefix = jnp.concatenate(
        [jnp.zeros((1, D), f32), jnp.cumsum(b32, axis=0)], axis=0)       # (L+1, D)
    gamma = jnp.sum(beta_prefix[:L] * w32, axis=-1)                      # (L,)
    beta_L = beta_prefix[L]                                              # (D,)

    # Lane-dense layout: features -> lanes (pad to 128); layers -> lanes of W^T.
    Dp = _round_up(D, _LANE)
    Lp = _round_up(L, _LANE)
    x0_p = jnp.pad(x0, ((0, 0), (0, Dp - D))) if Dp != D else x0
    wT_p = jnp.pad(jnp.transpose(w32), ((0, Dp - D), (0, Lp - L)))       # (Dp, Lp)
    gamma_p = jnp.pad(gamma, (0, Lp - L)).reshape(1, Lp)                 # (1, Lp)
    betaL_p = jnp.pad(beta_L, (0, Dp - D)).reshape(1, Dp)                # (1, Dp)

    io_itemsize = jnp.dtype(x0.dtype).itemsize
    if batch_tile is None:
        batch_tile = _pick_batch_tile(B, Dp, Lp, io_itemsize)
    batch_tile = max(_SUBLANE, (batch_tile // _SUBLANE) * _SUBLANE)

    Bp = _round_up(max(B, batch_tile), batch_tile)
    if Bp != B:
        x0_p = jnp.pad(x0_p, ((0, Bp - B), (0, 0)))

    kernel = functools.partial(crossnet_kernel, num_layers=L)
    grid = (Bp // batch_tile,)

    cost = pl.CostEstimate(
        flops=2 * Bp * Dp * Lp + 3 * Bp * Dp + 4 * Bp * L,
        transcendentals=0,
        bytes_accessed=2 * Bp * Dp * io_itemsize + Dp * Lp * 4 + (Dp + Lp) * 4,
    )

    out_p = pl.pallas_call(
        kernel,
        out_shape=jax.ShapeDtypeStruct((Bp, Dp), x0.dtype),
        grid_spec=pltpu.PrefetchScalarGridSpec(
            num_scalar_prefetch=0,
            grid=grid,
            in_specs=[
                pl.BlockSpec((batch_tile, Dp), lambda i: (i, 0)),   # X_0 tile
                pl.BlockSpec((Dp, Lp), lambda i: (0, 0)),           # W^T (resident)
                pl.BlockSpec((1, Lp), lambda i: (0, 0)),            # gamma (resident)
                pl.BlockSpec((1, Dp), lambda i: (0, 0)),            # beta_L (resident)
            ],
            out_specs=pl.BlockSpec((batch_tile, Dp), lambda i: (i, 0)),
        ),
        compiler_params=pltpu.CompilerParams(
            dimension_semantics=("parallel",),
            vmem_limit_bytes=_VMEM_LIMIT_BYTES,
        ),
        cost_estimate=cost,
    )(x0_p, wT_p, gamma_p, betaL_p)

    # Strip batch / feature padding.
    return out_p[:B, :D]


def crossnet_ref(x0, weights, biases):
    """Pure-JAX reference matching the PyTorch forward (layer-by-layer)."""
    xi = x0
    for i in range(weights.shape[0]):
        s = xi @ weights[i][:, None]                  # (B, 1)
        xi = xi + (s * x0 + biases[i][None, :])
    return xi


if __name__ == "__main__":
    key = jax.random.PRNGKey(0)
    B, D, L = 16, 32, 3                               # batch, input_dim, num_layers

    k_x, k_w, k_b = jax.random.split(key, 3)
    x0 = jax.random.normal(k_x, (B, D), dtype=jnp.float32)
    # torch.nn.Linear-style uniform init for the weight vectors; the module's
    # bias parameter is initialized to zeros.
    bound = 1.0 / (D ** 0.5)
    weights = jax.random.uniform(k_w, (L, D), dtype=jnp.float32,
                                 minval=-bound, maxval=bound)
    biases = jnp.zeros((L, D), dtype=jnp.float32)

    out = crossnet_forward(x0, weights, biases)
    out = jax.block_until_ready(out)
    ref = crossnet_ref(x0, weights, biases)
    assert out.shape == (B, D)
    assert jnp.allclose(out, ref, atol=1e-4, rtol=1e-4), "mismatch vs reference"

    # Extra check with non-zero biases to exercise the gamma/beta path.
    biases2 = 0.1 * jax.random.normal(k_b, (L, D), dtype=jnp.float32)
    out2 = jax.block_until_ready(crossnet_forward(x0, weights, biases2))
    ref2 = crossnet_ref(x0, weights, biases2)
    assert jnp.allclose(out2, ref2, atol=1e-4, rtol=1e-4), "mismatch (bias) vs reference"

    print("KERNEL_OK")
</pallas_src>

<mosaic_0001>
module attributes {stable_mosaic.version = 11 : i64} {
  func.func @crossnet_kernel(%arg0: i32, %arg1: memref<16x128xf32, #tpu.memory_space<vmem>>, %arg2: memref<128x128xf32, #tpu.memory_space<vmem>>, %arg3: memref<1x128xf32, #tpu.memory_space<vmem>>, %arg4: memref<1x128xf32, #tpu.memory_space<vmem>>, %arg5: memref<16x128xf32, #tpu.memory_space<vmem>>) attributes {dimension_semantics = [#tpu.dimension_semantics<parallel>], iteration_bounds = array<i64: 1>, scalar_prefetch = 0 : i64, scratch_operands = 0 : i64, tpu.core_type = #tpu.core_type<tc>, window_params = [{transform_indices = @transform_0, window_bounds = array<i64: 16, 128>}, {pipeline_mode = #tpu.pipeline_mode<synchronous>, transform_indices = @transform_1, window_bounds = array<i64: 128, 128>}, {pipeline_mode = #tpu.pipeline_mode<synchronous>, transform_indices = @transform_2, window_bounds = array<i64: 1, 128>}, {pipeline_mode = #tpu.pipeline_mode<synchronous>, transform_indices = @transform_3, window_bounds = array<i64: 1, 128>}, {transform_indices = @transform_4, window_bounds = array<i64: 16, 128>}]} {
    %c0 = arith.constant 0 : index
    %c0_0 = arith.constant 0 : index
    %0 = vector.load %arg1[%c0, %c0_0] : memref<16x128xf32, #tpu.memory_space<vmem>>, vector<16x128xf32>
    %c0_1 = arith.constant 0 : index
    %c0_2 = arith.constant 0 : index
    %1 = vector.load %arg2[%c0_1, %c0_2] : memref<128x128xf32, #tpu.memory_space<vmem>>, vector<128x128xf32>
    %cst = arith.constant dense<0.000000e+00> : vector<16x128xf32>
    %2 = tpu.matmul %0, %1, %cst {dimension_numbers = #tpu.dot_dimension_numbers<[1], [0], [0], [1], [0, 0, 1, 1], [], []>} : vector<16x128xf32>, vector<128x128xf32>, vector<16x128xf32> -> vector<16x128xf32>
    %c0_3 = arith.constant 0 : index
    %c0_4 = arith.constant 0 : index
    %3 = vector.load %arg3[%c0_3, %c0_4] : memref<1x128xf32, #tpu.memory_space<vmem>>, vector<1x128xf32>
    %cst_5 = arith.constant 1.000000e+00 : f32
    %4 = vector.broadcast %cst_5 : f32 to vector<16x1xf32>
    %5 = vector.extract_strided_slice %2 {offsets = [0, 0], sizes = [16, 1], strides = [1, 1]} : vector<16x128xf32> to vector<16x1xf32>
    %cst_6 = arith.constant 1.000000e+00 : f32
    %6 = vector.broadcast %cst_6 : f32 to vector<16x1xf32>
    %7 = arith.addf %6, %5 : vector<16x1xf32>
    %8 = arith.mulf %4, %7 : vector<16x1xf32>
    %9 = vector.extract_strided_slice %3 {offsets = [0, 0], sizes = [1, 1], strides = [1, 1]} : vector<1x128xf32> to vector<1x1xf32>
    %10 = vector.broadcast %9 : vector<1x1xf32> to vector<16x1xf32>
    %11 = arith.addf %8, %10 : vector<16x1xf32>
    %12 = vector.extract_strided_slice %2 {offsets = [0, 1], sizes = [16, 1], strides = [1, 1]} : vector<16x128xf32> to vector<16x1xf32>
    %cst_7 = arith.constant 1.000000e+00 : f32
    %13 = vector.broadcast %cst_7 : f32 to vector<16x1xf32>
    %14 = arith.addf %13, %12 : vector<16x1xf32>
    %15 = arith.mulf %11, %14 : vector<16x1xf32>
    %16 = vector.extract_strided_slice %3 {offsets = [0, 1], sizes = [1, 1], strides = [1, 1]} : vector<1x128xf32> to vector<1x1xf32>
    %17 = vector.broadcast %16 : vector<1x1xf32> to vector<16x1xf32>
    %18 = arith.addf %15, %17 : vector<16x1xf32>
    %19 = vector.extract_strided_slice %2 {offsets = [0, 2], sizes = [16, 1], strides = [1, 1]} : vector<16x128xf32> to vector<16x1xf32>
    %cst_8 = arith.constant 1.000000e+00 : f32
    %20 = vector.broadcast %cst_8 : f32 to vector<16x1xf32>
    %21 = arith.addf %20, %19 : vector<16x1xf32>
    %22 = arith.mulf %18, %21 : vector<16x1xf32>
    %23 = vector.extract_strided_slice %3 {offsets = [0, 2], sizes = [1, 1], strides = [1, 1]} : vector<1x128xf32> to vector<1x1xf32>
    %24 = vector.broadcast %23 : vector<1x1xf32> to vector<16x1xf32>
    %25 = arith.addf %22, %24 : vector<16x1xf32>
    %26 = vector.broadcast %25 : vector<16x1xf32> to vector<16x128xf32>
    %27 = arith.mulf %26, %0 : vector<16x128xf32>
    %c0_9 = arith.constant 0 : index
    %c0_10 = arith.constant 0 : index
    %28 = vector.load %arg4[%c0_9, %c0_10] : memref<1x128xf32, #tpu.memory_space<vmem>>, vector<1x128xf32>
    %29 = vector.broadcast %28 : vector<1x128xf32> to vector<16x128xf32>
    %30 = arith.addf %27, %29 : vector<16x128xf32>
    %c0_11 = arith.constant 0 : index
    %c0_12 = arith.constant 0 : index
    %31 = vector.load %arg5[%c0_11, %c0_12] : memref<16x128xf32, #tpu.memory_space<vmem>>, vector<16x128xf32>
    tpu.vector_store %arg5[%c0_11, %c0_12], %30 {strides = array<i32>} : memref<16x128xf32, #tpu.memory_space<vmem>>, vector<16x128xf32>,
    return
  }
  func.func @transform_0(%arg0: i32) -> (i32, i32) {
    %c0_i32 = arith.constant 0 : i32
    %c0_i32_0 = arith.constant 0 : i32
    return %arg0, %c0_i32 : i32, i32
  }
  func.func @transform_1(%arg0: i32) -> (i32, i32) {
    %c0_i32 = arith.constant 0 : i32
    %c0_i32_0 = arith.constant 0 : i32
    %c0_i32_1 = arith.constant 0 : i32
    return %c0_i32, %c0_i32_0 : i32, i32
  }
  func.func @transform_2(%arg0: i32) -> (i32, i32) {
    %c0_i32 = arith.constant 0 : i32
    %c0_i32_0 = arith.constant 0 : i32
    %c0_i32_1 = arith.constant 0 : i32
    return %c0_i32, %c0_i32_0 : i32, i32
  }
  func.func @transform_3(%arg0: i32) -> (i32, i32) {
    %c0_i32 = arith.constant 0 : i32
    %c0_i32_0 = arith.constant 0 : i32
    %c0_i32_1 = arith.constant 0 : i32
    return %c0_i32, %c0_i32_0 : i32, i32
  }
  func.func @transform_4(%arg0: i32) -> (i32, i32) {
    %c0_i32 = arith.constant 0 : i32
    %c0_i32_0 = arith.constant 0 : i32
    return %arg0, %c0_i32 : i32, i32
  }
}

</mosaic_0001>

<bundles_post_ra>
// kernel: tpu_custom_call.1
= control target key start
LH: loop header
LB: loop body
LE: loop exit
PB: predicated region body
PF: predicated region fallthrough
CT: control target
= control target key end

     0   :  { %9 = vsyncpa [#allocation3], 0  ;;  %s411_s0 = inlined_call_operand.hbm [shape: f32[16,128], index: 0, kind: input, shape index: {}]   ;;  %s412_s1 = inlined_call_operand.hbm [shape: f32[128,128], index: 1, kind: input, shape index: {}]   ;;  %s413_s2 = inlined_call_operand.vmem [shape: f32[1,128], index: 2, kind: input, shape index: {}]   ;;  %s414_s3 = inlined_call_operand.vmem [shape: f32[1,128], index: 3, kind: input, shape index: {}]   ;;  %s415_s4 = inlined_call_operand.hbm [shape: f32[16,128], index: 4, kind: output, shape index: {}]  }
   0x1   :  { %10 = vsyncpa [#allocation6], 0 }
   0x2   :  { %11 = vsyncpa [#allocation4], 0  ;;  %s350_s15 = smov [#allocation2]  }
   0x3   :  { %s17_s16 = sshll.u32 %s350_s15, 4  ;;  %s18_s16 = int_to_ptr.vmem [resolvable:$true] %s17_s16 }
   0x4   :  { %s292_s17 = scalar_lea.vmem %s18_s16, 256  ;;  %p297_p1 = scmp.lt.s32.totalorder %s18_s16, %s18_s16 }
   0x5   :  { %p293_p0 = scmp.ne.s32.totalorder %s18_s16, %s292_s17  ;;  %p298_p2 = scmp.lt.s32.totalorder %s292_s17, %s292_s17 }
   0x7   :  { %p299_p3 = por %p298_p2, %p297_p1 }
   0x9   :  { %p300_p4 = pnand %p299_p3, %p293_p0 }
   0xb   :  { %303 = shalt.err (!%p300_p4)
}
   0xc   :  { %s351_s18 = smov 128   ;;  %s352_s19 = smov 8  }
   0xd   :  { %23 = dma.hbm_to_vmem [thread:$0]  %s411_s0, 256, %s18_s16, [#allocation3], %s351_s18, %s351_s18, %s352_s19  }
   0xe   :  { %s353_s22 = smov [#allocation5]  }
   0xf   :  { %s29_s23 = sshll.u32 %s353_s22, 4  ;;  %s30_s23 = int_to_ptr.vmem [resolvable:$true] %s29_s23 }
  0x10   :  { %s312_s24 = scalar_lea.vmem %s30_s23, 2048  ;;  %p317_p6 = scmp.lt.s32.totalorder %s30_s23, %s30_s23 }
  0x11   :  { %p313_p5 = scmp.ne.s32.totalorder %s30_s23, %s312_s24  ;;  %p318_p7 = scmp.lt.s32.totalorder %s312_s24, %s312_s24 }
  0x13   :  { %p319_p8 = por %p318_p7, %p317_p6 }
  0x15   :  { %p320_p9 = pnand %p319_p8, %p313_p5 }
  0x17   :  { %323 = shalt.err (!%p320_p9)
}
  0x18   :  { %35 = dma.hbm_to_vmem [thread:$0]  %s412_s1, 2048, %s30_s23, [#allocation6], %s351_s18, %s351_s18, %s352_s19  }
  0x19   :  { %344 = dma.done.wait [#allocation3], 256  }
  0x1a   :  { %345 = vsyncadd [#allocation3], 4294967040 }
  0x1b   :  { %346 = dma.done.wait [#allocation6], 2048  }
  0x1c   :  { %347 = vsyncadd [#allocation6], 4294965248  ;;  %v63_v0 = vld [vmem:[#allocation5 + $0x78] sm:$0xff]  ;;  %v62_v1 = vld [vmem:[#allocation5 + $0x70] sm:$0xff]  ;;  %s354_s27 = smov 127   ;;  %v355_v21 = vmov 0  }
  0x1d   :  { %239 = vmatprep.subr.mxu0 %v63_v0  ;;  %v61_v2 = vld [vmem:[#allocation5 + $0x68] sm:$0xff]  ;;  %v60_v3 = vld [vmem:[#allocation5 + $0x60] sm:$0xff]  ;;  %v395_v4 = vld [vmem:[#allocation2] sm:$0xff]  ;;  %283 = vset.pattern.permute.xlu1 %v355_v21  ;;  %s356_s28 = smov 126   ;;  %s357_s30 = smov [#allocation7]  }
  0x1e   :  { %240 = vmatpush3.msra.mxu0 %v63_v0  ;;  %v59_v5 = vld [vmem:[#allocation5 + $0x58] sm:$0xff]  ;;  %271 = vmatprep.mubr.f32.mxu0 %v395_v4  ;;  %v58_v6 = vld [vmem:[#allocation5 + $0x50] sm:$0xff]  ;;  %v57_v7 = vld [vmem:[#allocation5 + $0x48] sm:$0xff]  ;;  %s206_s5 = sshll.u32 %s357_s30, 4  ;;  %s207_s5 = int_to_ptr.vmem [resolvable:$true] %s206_s5 }
  0x1f   :  { %241 = vmatprep.subr.mxu0 %v62_v1  ;;  %v56_v8 = vld [vmem:[#allocation5 + $0x40] sm:$0xff]  ;;  %v55_v9 = vld [vmem:[#allocation5 + $0x38] sm:$0xff]  ;;  %v54_v10 = vld [vmem:[#allocation5 + $0x30] sm:$0xff]  ;;  %282 = vset.pattern.permute.xlu0 %v355_v21  ;;  %s324_s6 = scalar_lea.vmem %s207_s5, 256  ;;  %p329_p11 = scmp.lt.s32.totalorder %s207_s5, %s207_s5 }
  0x20   :  { %242 = vmatpush3.msra.mxu0 %v62_v1  ;;  %v53_v11 = vld [vmem:[#allocation5 + $0x28] sm:$0xff]  ;;  %v52_v12 = vld [vmem:[#allocation5 + $0x20] sm:$0xff]  ;;  %v51_v13 = vld [vmem:[#allocation5 + $0x18] sm:$0xff]  ;;  %p325_p10 = scmp.ne.s32.totalorder %s207_s5, %s324_s6  ;;  %p330_p12 = scmp.lt.s32.totalorder %s324_s6, %s324_s6 }
  0x21   :  { %243 = vmatprep.subr.mxu0 %v61_v2  ;;  %v50_v14 = vld [vmem:[#allocation5 + $0x10] sm:$0xff]  ;;  %v49_v15 = vld [vmem:[#allocation5 + $0x8] sm:$0xff]  ;;  %v48_v16 = vld [vmem:[#allocation5] sm:$0xff] }
  0x22   :  { %244 = vmatpush3.msra.mxu0 %v61_v2  ;;  %v47_v17 = vld [vmem:[#allocation2 + $0x8] sm:$0xff]  ;;  %v219_v18 = vld [vmem:[%s413_s2] ss:$0 sm:$0xff]  ;;  %p331_p13 = por %p330_p12, %p329_p11 }
  0x23   :  { %245 = vmatprep.subr.mxu0 %v60_v3  ;;  %160 = vrot.lane.b32.xlu1 %v219_v18, %s354_s27  ;;  %v220_v40 = vld [vmem:[%s414_s3] ss:$0 sm:$0xff] }
  0x24   :  { %246 = vmatpush3.msra.mxu0 %v60_v3  ;;  %p332_p0 = pnand %p331_p13, %p325_p10 }
  0x25   :  { %247 = vmatprep.subr.mxu0 %v59_v5 }
  0x26   :  { %248 = vmatpush3.msra.mxu0 %v59_v5 }
  0x27   :  { %249 = vmatprep.subr.mxu0 %v58_v6 }
  0x28   :  { %250 = vmatpush3.msra.mxu0 %v58_v6 }
  0x29   :  { %251 = vmatprep.subr.mxu0 %v57_v7 }
  0x2a   :  { %252 = vmatpush3.msra.mxu0 %v57_v7 }
  0x2b   :  { %253 = vmatprep.subr.mxu0 %v56_v8 }
  0x2c   :  { %254 = vmatpush3.msra.mxu0 %v56_v8 }
  0x2d   :  { %255 = vmatprep.subr.mxu0 %v55_v9 }
  0x2e   :  { %256 = vmatpush3.msra.mxu0 %v55_v9 }
  0x2f   :  { %257 = vmatprep.subr.mxu0 %v54_v10 }
  0x30   :  { %258 = vmatpush3.msra.mxu0 %v54_v10 }
  0x31   :  { %259 = vmatprep.subr.mxu0 %v53_v11 }
  0x32   :  { %260 = vmatpush3.msra.mxu0 %v53_v11 }
  0x33   :  { %261 = vmatprep.subr.mxu0 %v52_v12 }
  0x34   :  { %262 = vmatpush3.msra.mxu0 %v52_v12 }
  0x35   :  { %263 = vmatprep.subr.mxu0 %v51_v13 }
  0x36   :  { %264 = vmatpush3.msra.mxu0 %v51_v13 }
  0x37   :  { %265 = vmatprep.subr.mxu0 %v50_v14 }
  0x38   :  { %266 = vmatpush3.msra.mxu0 %v50_v14 }
  0x39   :  { %267 = vmatprep.subr.mxu0 %v49_v15 }
  0x3a   :  { %268 = vmatpush3.msra.mxu0 %v49_v15 }
  0x3b   :  { %269 = vmatprep.subr.mxu0 %v48_v16 }
  0x3c   :  { %270 = vmatpush3.msra.mxu0 %v48_v16 }
  0x3d   :  { %272 = vmatmul.mubr.f32.vlgmr.msra.gmra.mxu0 %v47_v17 }
  0x95   :  { %v161_v24 = vpop.permute.xlu1 %160 }
  0xfd   :  { %v273_v19 = vpop.f32.mrf.mxu0 }
  0xfe   :  { %v141_v20 = vadd.f32 1.0, %v273_v19 }
  0xff   :  { %v130_v22 = vpop.f32.mrf.mxu0 }
 0x100   :  { %v140_v23 = vadd.f32 1.0, %v130_v22  ;;  %154 = vrot.lane.b32.xlu0 %v141_v20, %s354_s27  ;;  %v149_v26 = vadd.f32 %v219_v18, %v141_v20 }
 0x102   :  { %165 = vrot.lane.b32.xlu1 %v140_v23, %s356_s28  ;;  %v148_v28 = vadd.f32 %v219_v18, %v140_v23 }
 0x104   :  { %152 = vrot.lane.b32.xlu0 %v140_v23, %s354_s27 }
 0x106   :  { %173 = vrot.lane.b32.xlu1 %v219_v18, %s356_s28 }
 0x108   :  { %167 = vrot.lane.b32.xlu0 %v141_v20, %s356_s28 }
 0x172   :  { %v155_v25 = vpop.permute.xlu0 %154 }
 0x173   :  { %v159_v27 = vmul.f32 %v155_v25, %v149_v26 }
 0x174   :  { %v166_v29 = vpop.permute.xlu1 %165 }
 0x175   :  { %v164_v33 = vadd.f32 %v161_v24, %v159_v27 }
 0x176   :  { %v153_v30 = vpop.permute.xlu0 %152 }
 0x177   :  { %v158_v31 = vmul.f32 %v153_v30, %v148_v28 }
 0x178   :  { %v174_v35 = vpop.permute.xlu1 %173 }
 0x179   :  { %v163_v32 = vadd.f32 %v161_v24, %v158_v31 }
 0x17a   :  { %v168_v34 = vpop.permute.xlu0 %167 }
 0x17b   :  { %v172_v36 = vmul.f32 %v168_v34, %v164_v33  ;;  %v171_v37 = vmul.f32 %v166_v29, %v163_v32 }
 0x17d   :  { %v176_v38 = vadd.f32 %v174_v35, %v171_v37  ;;  %v177_v39 = vadd.f32 %v174_v35, %v172_v36 }
 0x17f   :  { %185 = vperm.xlu1 %283, %v177_v39   ;;  %180 = vperm.xlu0 %282, %v176_v38  }
 0x1fa   :  { %v186_v41 = vpop.permute.xlu1 %185  ;;  %v181_v42 = vpop.permute.xlu0 %180 }
 0x1fb   :  { %v189_v43 = vmul.f32 %v186_v41, %v47_v17  ;;  %v188_v44 = vmul.f32 %v181_v42, %v395_v4 }
 0x1fd   :  { %v198_v45 = vadd.f32 %v220_v40, %v189_v43  ;;  %v197_v46 = vadd.f32 %v220_v40, %v188_v44 }
 0x1ff   :  { %200 = vst [vmem:[#allocation7 + $0x8] sm:$0xff] %v198_v45  ;;  %199 = vst [vmem:[#allocation7] sm:$0xff] %v197_v46 }
 0x200   :  { %335 = shalt.err (!%p332_p0)
}
 0x201   :  { %212 = dma.vmem_to_hbm [thread:$0]  %s207_s5, 256, %s415_s4, [#allocation4], %s351_s18, %s351_s18, %s352_s19  }
 0x202   :  { %348 = dma.done.wait [#allocation4], 256  }
 0x203   :  { %349 = vsyncadd [#allocation4], 4294967040 }
 0x204   :  { %216 = vsyncpa [#allocation3], 1 }
 0x205   :  { %217 = vsyncpa [#allocation6], 1 }
 0x206   :  { %218 = vsyncpa [#allocation4], 1 }

</bundles_post_ra>
